<compile_context>
chip_gen: v6e
topology: v6e:2x2x1
jax: 0.10.0
libtpu: 0.0.40
codegen_flags: <defaults>
</compile_context>

<pallas_src>
import functools

import jax
import jax.numpy as jnp
from jax.experimental import pallas as pl
from jax.experimental.pallas import tpu as pltpu

_EPS = 1e-5
_LANE = 128
_MAX_BLOCK_BYTES = 2 * 1024 * 1024  # ~2 MiB per input block (per-TC safe on v5e/v6e/v7x)


def _withbias_ln_kernel(x_ref, w_ref, b_ref, o_ref):
    # x_ref: (1, C, T) — C on sublanes, T (spatial) on lanes.
    x = x_ref[...].astype(jnp.float32)
    c = x.shape[1]

    # One fused sweep over C: sum and sum-of-squares (elementwise VALU accum).
    s1 = jnp.sum(x, axis=1, keepdims=True)        # (1, 1, T)
    s2 = jnp.sum(x * x, axis=1, keepdims=True)    # (1, 1, T)
    inv_c = jnp.float32(1.0 / c)
    mu = s1 * inv_c
    var = jnp.maximum(s2 * inv_c - mu * mu, 0.0)  # unbiased=False
    inv = jax.lax.rsqrt(var + _EPS)               # transcendental -> EUP slot

    w = w_ref[...].astype(jnp.float32)            # (1, C, 1)
    b = b_ref[...].astype(jnp.float32)            # (1, C, 1)
    y = (x - mu) * inv * w + b
    o_ref[...] = y.astype(o_ref.dtype)


def _pick_tile_hw(c, hw, itemsize, max_block_bytes):
    # Largest lane-aligned tile whose (C, tile) block stays under the byte cap.
    max_tile = max(_LANE, (max_block_bytes // (c * itemsize)) // _LANE * _LANE)
    if hw <= max_tile:
        return hw          # full spatial extent in one block (allowed: equals full dim)
    return max_tile        # multiple of 128; cdiv grid masks the partial last block


@functools.partial(jax.jit, static_argnames=("max_block_bytes",))
def withbias_layernorm_nchw(x, weight, bias, *, max_block_bytes=_MAX_BLOCK_BYTES):
    """Equivalent of to_3d -> WithBias_LayerNorm(C) -> to_4d for NCHW x."""
    b, c, h, w = x.shape
    hw = h * w

    x3 = x.reshape(b, c, hw)          # free reshape, no data movement
    w3 = weight.reshape(1, c, 1)
    b3 = bias.reshape(1, c, 1)

    itemsize = jnp.dtype(x.dtype).itemsize
    tile_hw = _pick_tile_hw(c, hw, itemsize, max_block_bytes)
    grid = (b, pl.cdiv(hw, tile_hw))

    x_spec = pl.BlockSpec((1, c, tile_hw), lambda i, j: (i, 0, j))
    p_spec = pl.BlockSpec((1, c, 1), lambda i, j: (0, 0, 0))

    out3 = pl.pallas_call(
        _withbias_ln_kernel,
        out_shape=jax.ShapeDtypeStruct((b, c, hw), x.dtype),
        grid=grid,
        in_specs=[x_spec, p_spec, p_spec],
        out_specs=x_spec,
        compiler_params=pltpu.CompilerParams(
            dimension_semantics=("parallel", "parallel")),
    )(x3, w3, b3)

    return out3.reshape(b, c, h, w)


def _reference(x, weight, bias):
    xf = x.astype(jnp.float32)
    mu = jnp.mean(xf, axis=1, keepdims=True)
    var = jnp.mean((xf - mu) ** 2, axis=1, keepdims=True)
    y = (xf - mu) / jnp.sqrt(var + _EPS)
    y = y * weight.reshape(1, -1, 1, 1) + bias.reshape(1, -1, 1, 1)
    return y.astype(x.dtype)


if __name__ == "__main__":
    key = jax.random.PRNGKey(0)

    ok = True
    # (shape, max_block_bytes): last case forces tile_hw=128 with a partial
    # (masked) final block to exercise the cdiv boundary path.
    cases = [
        ((2, 4, 16, 16), _MAX_BLOCK_BYTES),
        ((2, 48, 16, 16), _MAX_BLOCK_BYTES),
        ((1, 4, 20, 20), 2048),
    ]
    for (B, C, H, W), cap in cases:
        kx, kw, kb, key = jax.random.split(key, 4)
        x = jax.random.normal(kx, (B, C, H, W), dtype=jnp.float32)
        weight = jax.random.normal(kw, (C,), dtype=jnp.float32)
        bias = jax.random.normal(kb, (C,), dtype=jnp.float32)

        out = withbias_layernorm_nchw(x, weight, bias, max_block_bytes=cap)
        out = jax.block_until_ready(out)
        ref = _reference(x, weight, bias)

        if out.shape != (B, C, H, W):
            ok = False
        if not jnp.allclose(out, ref, atol=2e-5, rtol=2e-5):
            ok = False

    if ok:
        print("KERNEL_OK")
</pallas_src>

<mosaic_0001>
module attributes {stable_mosaic.version = 11 : i64} {
  func.func @_withbias_ln_kernel(%arg0: i32, %arg1: i32, %arg2: memref<1x4x256xf32, #tpu.memory_space<vmem>>, %arg3: memref<1x4x1xf32, #tpu.memory_space<vmem>>, %arg4: memref<1x4x1xf32, #tpu.memory_space<vmem>>, %arg5: memref<1x4x256xf32, #tpu.memory_space<vmem>>) attributes {dimension_semantics = [#tpu.dimension_semantics<parallel>, #tpu.dimension_semantics<parallel>], iteration_bounds = array<i64: 2, 1>, scalar_prefetch = 0 : i64, scratch_operands = 0 : i64, tpu.core_type = #tpu.core_type<tc>, window_params = [{transform_indices = @transform_0, window_bounds = array<i64: 1, 4, 256>}, {pipeline_mode = #tpu.pipeline_mode<synchronous>, transform_indices = @transform_1, window_bounds = array<i64: 1, 4, 1>}, {pipeline_mode = #tpu.pipeline_mode<synchronous>, transform_indices = @transform_2, window_bounds = array<i64: 1, 4, 1>}, {transform_indices = @transform_3, window_bounds = array<i64: 1, 4, 256>}]} {
    %c0 = arith.constant 0 : index
    %c0_0 = arith.constant 0 : index
    %c0_1 = arith.constant 0 : index
    %0 = vector.load %arg2[%c0, %c0_0, %c0_1] : memref<1x4x256xf32, #tpu.memory_space<vmem>>, vector<1x4x256xf32>
    %cst = arith.constant dense<0.000000e+00> : vector<1x256xf32>
    %1 = vector.multi_reduction <add>, %0, %cst [1] : vector<1x4x256xf32> to vector<1x256xf32>
    %2 = vector.shape_cast %1 : vector<1x256xf32> to vector<1x1x256xf32>
    %3 = arith.mulf %0, %0 : vector<1x4x256xf32>
    %cst_2 = arith.constant dense<0.000000e+00> : vector<1x256xf32>
    %4 = vector.multi_reduction <add>, %3, %cst_2 [1] : vector<1x4x256xf32> to vector<1x256xf32>
    %5 = vector.shape_cast %4 : vector<1x256xf32> to vector<1x1x256xf32>
    %cst_3 = arith.constant 2.500000e-01 : f32
    %6 = vector.broadcast %cst_3 : f32 to vector<1x1x256xf32>
    %7 = arith.mulf %2, %6 : vector<1x1x256xf32>
    %cst_4 = arith.constant 2.500000e-01 : f32
    %8 = vector.broadcast %cst_4 : f32 to vector<1x1x256xf32>
    %9 = arith.mulf %5, %8 : vector<1x1x256xf32>
    %10 = arith.mulf %7, %7 : vector<1x1x256xf32>
    %11 = arith.subf %9, %10 : vector<1x1x256xf32>
    %cst_5 = arith.constant 0.000000e+00 : f32
    %12 = vector.broadcast %cst_5 : f32 to vector<1x1x256xf32>
    %13 = arith.maximumf %11, %12 : vector<1x1x256xf32>
    %cst_6 = arith.constant 9.99999974E-6 : f32
    %14 = vector.broadcast %cst_6 : f32 to vector<1x1x256xf32>
    %15 = arith.addf %13, %14 : vector<1x1x256xf32>
    %16 = math.rsqrt %15 : vector<1x1x256xf32>
    %c0_7 = arith.constant 0 : index
    %c0_8 = arith.constant 0 : index
    %c0_9 = arith.constant 0 : index
    %17 = vector.load %arg3[%c0_7, %c0_8, %c0_9] : memref<1x4x1xf32, #tpu.memory_space<vmem>>, vector<1x4x1xf32>
    %c0_10 = arith.constant 0 : index
    %c0_11 = arith.constant 0 : index
    %c0_12 = arith.constant 0 : index
    %18 = vector.load %arg4[%c0_10, %c0_11, %c0_12] : memref<1x4x1xf32, #tpu.memory_space<vmem>>, vector<1x4x1xf32>
    %19 = vector.broadcast %7 : vector<1x1x256xf32> to vector<1x4x256xf32>
    %20 = arith.subf %0, %19 : vector<1x4x256xf32>
    %21 = vector.broadcast %16 : vector<1x1x256xf32> to vector<1x4x256xf32>
    %22 = arith.mulf %20, %21 : vector<1x4x256xf32>
    %23 = vector.broadcast %17 : vector<1x4x1xf32> to vector<1x4x256xf32>
    %24 = arith.mulf %22, %23 : vector<1x4x256xf32>
    %25 = vector.broadcast %18 : vector<1x4x1xf32> to vector<1x4x256xf32>
    %26 = arith.addf %24, %25 : vector<1x4x256xf32>
    %c0_13 = arith.constant 0 : index
    %c0_14 = arith.constant 0 : index
    %c0_15 = arith.constant 0 : index
    %27 = vector.load %arg5[%c0_13, %c0_14, %c0_15] : memref<1x4x256xf32, #tpu.memory_space<vmem>>, vector<1x4x256xf32>
    tpu.vector_store %arg5[%c0_13, %c0_14, %c0_15], %26 {strides = array<i32>} : memref<1x4x256xf32, #tpu.memory_space<vmem>>, vector<1x4x256xf32>,
    return
  }
  func.func @transform_0(%arg0: i32, %arg1: i32) -> (i32, i32, i32) {
    %c0_i32 = arith.constant 0 : i32
    %c0_i32_0 = arith.constant 0 : i32
    return %arg0, %c0_i32, %arg1 : i32, i32, i32
  }
  func.func @transform_1(%arg0: i32, %arg1: i32) -> (i32, i32, i32) {
    %c0_i32 = arith.constant 0 : i32
    %c0_i32_0 = arith.constant 0 : i32
    %c0_i32_1 = arith.constant 0 : i32
    %c0_i32_2 = arith.constant 0 : i32
    return %c0_i32, %c0_i32_0, %c0_i32_1 : i32, i32, i32
  }
  func.func @transform_2(%arg0: i32, %arg1: i32) -> (i32, i32, i32) {
    %c0_i32 = arith.constant 0 : i32
    %c0_i32_0 = arith.constant 0 : i32
    %c0_i32_1 = arith.constant 0 : i32
    %c0_i32_2 = arith.constant 0 : i32
    return %c0_i32, %c0_i32_0, %c0_i32_1 : i32, i32, i32
  }
  func.func @transform_3(%arg0: i32, %arg1: i32) -> (i32, i32, i32) {
    %c0_i32 = arith.constant 0 : i32
    %c0_i32_0 = arith.constant 0 : i32
    return %arg0, %c0_i32, %arg1 : i32, i32, i32
  }
}

</mosaic_0001>

<bundles_post_ra>
// kernel: withbias_layernorm_nchw.1
= control target key start
LH: loop header
LB: loop body
LE: loop exit
PB: predicated region body
PF: predicated region fallthrough
CT: control target
= control target key end

     0   :  { %s478_s12 = smov 0   ;;  %s480_s13 = smov 0   ;;  %s524_s0 = inlined_call_operand.vmem [shape: f32[2,4,256], index: 0, kind: input, shape index: {}]   ;;  %s525_s1 = inlined_call_operand.vmem [shape: f32[1,4,1], index: 1, kind: input, shape index: {}]   ;;  %s526_s2 = inlined_call_operand.vmem [shape: f32[1,4,1], index: 2, kind: input, shape index: {}]   ;;  %s527_s3 = inlined_call_operand.vmem [shape: f32[2,4,256], index: 3, kind: output, shape index: {}]  }
   0x1   :  { %s482_s14 = smov 0  }
   0x2 LB: > { %s25_s15 = sadd.s32 1, %s450_s13  ;;  %p391_p0 = scmp.ge.s32.totalorder %s454_s14, 1  ;;  %s454_s14 = sphi %s482_s14, %s13_s14   ;;  %s450_s13 = sphi %s480_s13, %s529_s13   ;;  %s446_s12 = sphi %s478_s12, %s528_s12  }
   0x3   : > { %p27_p1 = scmp.ge.s32.totalorder %s25_s15, 2  ;;  %p158_p2 = scmp.lt.s32.totalorder %s454_s14, 3 }
   0x5   : > { %s531_s15 = smov (%p27_p1, %s25_s15), 0  ;;  %p159_p3 = pnand %p391_p0, %p158_p2 }
   0x6   : > { %p191_p4 = scmp.lt.s32.totalorder (!%p159_p3), %s446_s12, 1 }
   0x7   : > { %162 = sbr.rel (%p159_p3) target bundleno = 147 (0x93), region = 32 }
   0xc   : > { %v261_v0 = vld [vmem:[%s525_s1] sm:$0xf]  ;;  %v456_v1 = vmov 0   ;;  %s533_s12 = smov (!%p191_p4, %s446_s12), 1  ;;  %vm214_vm0 = vcmask 1043456   ;;  %v280_v49 = vlaneseq }
   0xd   : > { %426 = vset.pattern.permute.xlu0 %v456_v1  ;;  %v262_v2 = vld [vmem:[%s526_s2] sm:$0xf]  ;;  %s398_s20 = sshll.u32 %s533_s12, 3  ;;  %v457_v47 = vmov 839922192  }
   0xe   : > { %275 = vperm.xlu0 %426, %v261_v0   ;;  %s198_s23 = scalar_lea.vmem %s524_s0, %s398_s20  ;;  %v278_v48 = vunpack.c.l.s4 %v457_v47  ;;  %v281_v52 = vshrl.u32 %v280_v49, 7  ;;  %s208_s26 = scalar_lea.vmem %s527_s3, %s398_s20 }
   0xf   : > { %v210_v3 = vld [vmem:[%s198_s23] sm:$0xff] }
  0x10   : > { %v212_v4 = vcombine.high %v210_v3, %v210_v3  ;;  %v229_v5 = vmul.f32 %v210_v3, %v210_v3  ;;  %v215_v6 = vsel %vm214_vm0, %v210_v3, 0.0  ;;  %v279_v51 = vunpack.c.0.s8 %v278_v48 }
  0x11   : > { %v216_v9 = vrot.slane %v215_v6, 4 }
  0x12   : > { %288 = vperm.xlu0 %426, %v262_v2   ;;  %v222_v7 = vsel %vm214_vm0, %v212_v4, 0.0  ;;  %v231_v8 = vcombine.high %v229_v5, %v229_v5  ;;  %v233_v11 = vsel %vm214_vm0, %v229_v5, 0.0  ;;  %v282_v55 = vsub.s32 %v279_v51, %v281_v52 }
  0x13   : > { %v223_v10 = vrot.slane %v222_v7, 4  ;;  %v217_v13 = vadd.f32 %v216_v9, %v215_v6  ;;  %v234_v14 = vrot.slane %v233_v11, 4 }
  0x14   : > { %v240_v12 = vsel %vm214_vm0, %v231_v8, 0.0 }
  0x15   : > { %v224_v15 = vadd.f32 %v223_v10, %v222_v7  ;;  %v241_v16 = vrot.slane %v240_v12, 4  ;;  %v218_v17 = vrot.slane %v217_v13, 2  ;;  %v235_v18 = vadd.f32 %v234_v14, %v233_v11 }
  0x17   : > { %v225_v19 = vrot.slane %v224_v15, 2  ;;  %v242_v20 = vadd.f32 %v241_v16, %v240_v12  ;;  %v219_v21 = vadd.f32 %v218_v17, %v217_v13  ;;  %v236_v22 = vrot.slane %v235_v18, 2 }
  0x19   : > { %v226_v23 = vadd.f32 %v225_v19, %v224_v15  ;;  %v243_v24 = vrot.slane %v242_v20, 2  ;;  %v220_v25 = vrot.slane %v219_v21, 1  ;;  %v237_v26 = vadd.f32 %v236_v22, %v235_v18 }
  0x1b   : > { %v227_v27 = vrot.slane %v226_v23, 1  ;;  %v244_v28 = vadd.f32 %v243_v24, %v242_v20  ;;  %v221_v29 = vadd.f32 %v220_v25, %v219_v21  ;;  %v238_v30 = vrot.slane %v237_v26, 1 }
  0x1d   : > { %v228_v31 = vadd.f32 %v227_v27, %v226_v23  ;;  %v245_v32 = vrot.slane %v244_v28, 1  ;;  %v239_v33 = vadd.f32 %v238_v30, %v237_v26  ;;  %v247_v34 = vmul.f32 0.25, %v221_v29 }
  0x1f   : > { %v246_v35 = vadd.f32 %v245_v32, %v244_v28  ;;  %v248_v36 = vmul.f32 0.25, %v228_v31  ;;  %v249_v37 = vmul.f32 0.25, %v239_v33  ;;  %v251_v38 = vmul.f32 %v247_v34, %v247_v34 }
  0x21   : > { %v250_v39 = vmul.f32 0.25, %v246_v35  ;;  %v252_v40 = vmul.f32 %v248_v36, %v248_v36  ;;  %v253_v41 = vsub.f32 %v249_v37, %v251_v38  ;;  %v265_v53 = vcombine.low %v247_v34, %v248_v36 }
  0x23   : > { %v254_v42 = vsub.f32 %v250_v39, %v252_v40  ;;  %v255_v43 = vmax.f32 %v253_v41, 0.0  ;;  %v267_v56 = vsub.f32 %v210_v3, %v265_v53 }
  0x25   : > { %v256_v44 = vmax.f32 %v254_v42, 0.0  ;;  %v257_v45 = vadd.f32 1e-05, %v255_v43 }
  0x27   : > { %v258_v46 = vadd.f32 1e-05, %v256_v44  ;;  %428 = vrsqrt.f32 %v257_v45 }
  0x29   : > { %430 = vrsqrt.f32 %v258_v46 }
  0x34   : > { %v429_v50 = vpop.eup %428 }
  0x36   : > { %v431_v54 = vpop.eup %430 }
  0x37   : > { %v270_v57 = vcombine.low %v429_v50, %v431_v54 }
  0x39   : > { %v272_v59 = vmul.f32 %v270_v57, %v267_v56 }
  0x89   : > { %v276_v58 = vpop.permute.xlu0 %275 }
  0x8a   : > { %v283_v60 = vrot.slane %v276_v58, %v282_v55 }
  0x8c   : > { %v285_v62 = vmul.f32 %v283_v60, %v272_v59 }
  0x8d   : > { %v289_v61 = vpop.permute.xlu0 %288 }
  0x8e   : > { %v296_v63 = vrot.slane %v289_v61, %v282_v55 }
  0x90   : > { %v298_v0 = vadd.f32 %v296_v63, %v285_v62 }
  0x92   : > { %299 = vst [vmem:[%s208_s26] sm:$0xff] %v298_v0 }
  0x93 PF: > { %s13_s14 = sadd.s32 1, %s454_s14   ;;  %s528_s12 = smov %s450_s13 }
  0x94   : > { %p10_p5 = scmp.ge.s32.totalorder %s13_s14, 4   ;;  %s529_s13 = smov %s531_s15 }
  0x96   :  { %12 = sbr.rel (!%p10_p5) target bundleno = 2 (0x2), region = 62 }

</bundles_post_ra>
